<compile_context>
chip_gen: v7x
topology: tpu7x:2x2x1
jax: 0.10.0
libtpu: 0.0.40
codegen_flags: <defaults>
</compile_context>

<pallas_src>
import functools
import math

import jax
import jax.numpy as jnp
from jax import lax
from jax.experimental import pallas as pl
from jax.experimental.pallas import tpu as pltpu


def _layernorm_kernel(x_ref, w_ref, b_ref, o_ref, *, eps):
    # Mixed precision: statistics + normalization in float32, output cast back
    # to the input dtype.
    x = x_ref[...].astype(jnp.float32)                       # (TR, H)
    mean = jnp.mean(x, axis=-1, keepdims=True)               # (TR, 1)  XLU reduce
    mean_sq = jnp.mean(x * x, axis=-1, keepdims=True)        # (TR, 1)  XLU reduce
    var = jnp.maximum(mean_sq - mean * mean, 0.0)            # E[x^2] - E[x]^2
    invvar = lax.rsqrt(var + eps)                            # EUP
    w = w_ref[...].astype(jnp.float32)                       # (1, H)
    b = b_ref[...].astype(jnp.float32)                       # (1, H)
    o_ref[...] = ((x - mean) * invvar * w + b).astype(o_ref.dtype)


def _pick_block_rows(rows, hidden, itemsize):
    """Largest dtype-aligned row tile whose double-buffered in/out + f32
    temporaries fit comfortably in the smallest physical VMEM (v7x: 64 MiB),
    while keeping enough grid steps for megacore sharding on v7x."""
    # Sublane packing: 8 rows/vreg for 4-byte, 16 for 2-byte, 32 for 1-byte.
    row_align = max(8, 32 // max(itemsize, 1))
    # Per row: 2x double-buffered (in + out) at native dtype + ~2 f32 temporaries.
    bytes_per_row = hidden * (4 * itemsize + 8)
    budget = 48 * 1024 * 1024
    block_rows = min(1024, max(1, budget // bytes_per_row))
    block_rows = max(row_align, (block_rows // row_align) * row_align)
    # Prefer >= ~8 grid steps on large problems (v7x has 2 TensorCores sharing
    # the parallel grid axis), but never shrink below 8 vregs worth of rows.
    steps_cap = max(8 * row_align, pl.cdiv(pl.cdiv(rows, 8), row_align) * row_align)
    block_rows = min(block_rows, steps_cap)
    # Never exceed the (alignment-rounded) problem size.
    block_rows = min(block_rows, pl.cdiv(rows, row_align) * row_align)
    return int(block_rows)


def mixed_fused_layer_norm(x, weight, bias, eps=1e-5, *, block_rows=None):
    """Forward of MixedFusedLayerNorm (affine LayerNorm over normalized_shape)."""
    normalized_shape = weight.shape
    n_norm = len(normalized_shape)
    assert x.shape[x.ndim - n_norm:] == normalized_shape, (
        "trailing dims of input must match normalized_shape")
    hidden = math.prod(normalized_shape)
    lead_shape = x.shape[:x.ndim - n_norm]
    rows = math.prod(lead_shape) if lead_shape else 1

    x2 = x.reshape(rows, hidden)
    w2 = weight.reshape(1, hidden)
    b2 = bias.reshape(1, hidden)

    itemsize = jnp.dtype(x.dtype).itemsize
    if block_rows is None:
        block_rows = _pick_block_rows(rows, hidden, itemsize)

    # No pad/slice HBM round-trip: rows are independent, so the partial last
    # block (if any) is handled by Pallas' masked output writes.
    grid = (pl.cdiv(rows, block_rows),)

    # Note: production widths (4096, 8192, ...) are lane-aligned (H % 128 == 0),
    # giving unmasked full-width stores; ragged H still works (block covers the
    # full hidden dim) but takes masked stores.
    tile_bytes = block_rows * hidden * itemsize
    wb_bytes = 2 * hidden * (jnp.dtype(weight.dtype).itemsize
                             + jnp.dtype(bias.dtype).itemsize)
    # double-buffered in + out at native dtype + f32 kernel temporaries + params
    vmem_bytes = 4 * tile_bytes + 2 * block_rows * hidden * 4 + wb_bytes + (4 << 20)
    vmem_bytes = int(min(max(vmem_bytes, 16 << 20), 64 << 20))

    out = pl.pallas_call(
        functools.partial(_layernorm_kernel, eps=eps),
        out_shape=jax.ShapeDtypeStruct((rows, hidden), x.dtype),
        grid_spec=pltpu.PrefetchScalarGridSpec(
            num_scalar_prefetch=0,
            grid=grid,
            in_specs=[
                pl.BlockSpec((block_rows, hidden), lambda i: (i, 0)),
                pl.BlockSpec((1, hidden), lambda i: (0, 0)),
                pl.BlockSpec((1, hidden), lambda i: (0, 0)),
            ],
            out_specs=pl.BlockSpec((block_rows, hidden), lambda i: (i, 0)),
        ),
        compiler_params=pltpu.CompilerParams(
            dimension_semantics=("parallel",),
            vmem_limit_bytes=vmem_bytes,
        ),
    )(x2, w2, b2)

    return out.reshape(x.shape)


class MixedFusedLayerNormJAX:
    """Deterministic stand-in for megatron MixedFusedLayerNorm (forward only)."""

    def __init__(self, normalized_shape, eps=1e-5):
        if isinstance(normalized_shape, int):
            normalized_shape = (normalized_shape,)
        self.normalized_shape = tuple(normalized_shape)
        self.eps = eps
        # reset_parameters(): weight = ones, bias = zeros
        self.weight = jnp.ones(self.normalized_shape, dtype=jnp.float32)
        self.bias = jnp.zeros(self.normalized_shape, dtype=jnp.float32)
        # TODO(synk): layernorm_tp_auto_sync all-reduce over the TP group is a
        # distributed no-op for a single-device synthetic kernel; skipped.

    def __call__(self, x):
        return mixed_fused_layer_norm(x, self.weight, self.bias, self.eps)


def _reference_layernorm(x, weight, bias, eps):
    mean = jnp.mean(x, axis=-1, keepdims=True)
    var = jnp.mean((x - mean) ** 2, axis=-1, keepdims=True)
    return (x - mean) * lax.rsqrt(var + eps) * weight + bias


if __name__ == "__main__":
    key = jax.random.PRNGKey(0)
    batch, seq, hidden = 2, 8, 32
    x = jax.random.normal(key, (batch, seq, hidden), dtype=jnp.float32)

    ln = MixedFusedLayerNormJAX(hidden, eps=1e-5)
    out = jax.block_until_ready(ln(x))
    ref = _reference_layernorm(x, ln.weight, ln.bias, 1e-5)
    assert jnp.allclose(out, ref, atol=1e-5, rtol=1e-5), "mismatch vs reference"

    # Second check: row count not a multiple of the row tile -> exercises the
    # masked partial-block path (no pad/slice in the wrapper).
    key2 = jax.random.PRNGKey(1)
    x2 = jax.random.normal(key2, (3, 5, hidden), dtype=jnp.float32)
    out2 = jax.block_until_ready(ln(x2))
    ref2 = _reference_layernorm(x2, ln.weight, ln.bias, 1e-5)
    assert jnp.allclose(out2, ref2, atol=1e-5, rtol=1e-5), "mismatch (ragged rows)"

    print("KERNEL_OK")
</pallas_src>

<mosaic_0001>
module attributes {stable_mosaic.version = 11 : i64} {
  func.func @_layernorm_kernel(%arg0: i32, %arg1: memref<16x32xf32, #tpu.memory_space<vmem>>, %arg2: memref<1x32xf32, #tpu.memory_space<vmem>>, %arg3: memref<1x32xf32, #tpu.memory_space<vmem>>, %arg4: memref<16x32xf32, #tpu.memory_space<vmem>>) attributes {dimension_semantics = [#tpu.dimension_semantics<parallel>], iteration_bounds = array<i64: 1>, scalar_prefetch = 0 : i64, scratch_operands = 0 : i64, tpu.core_type = #tpu.core_type<tc>, window_params = [{transform_indices = @transform_0, window_bounds = array<i64: 16, 32>}, {pipeline_mode = #tpu.pipeline_mode<synchronous>, transform_indices = @transform_1, window_bounds = array<i64: 1, 32>}, {pipeline_mode = #tpu.pipeline_mode<synchronous>, transform_indices = @transform_2, window_bounds = array<i64: 1, 32>}, {transform_indices = @transform_3, window_bounds = array<i64: 16, 32>}]} {
    %c0 = arith.constant 0 : index
    %c0_0 = arith.constant 0 : index
    %0 = vector.load %arg1[%c0, %c0_0] : memref<16x32xf32, #tpu.memory_space<vmem>>, vector<16x32xf32>
    %cst = arith.constant dense<0.000000e+00> : vector<16xf32>
    %1 = vector.multi_reduction <add>, %0, %cst [1] : vector<16x32xf32> to vector<16xf32>
    %2 = vector.shape_cast %1 : vector<16xf32> to vector<16x1xf32>
    %cst_1 = arith.constant 3.200000e+01 : f32
    %3 = vector.broadcast %cst_1 : f32 to vector<16x1xf32>
    %4 = arith.divf %2, %3 : vector<16x1xf32>
    %5 = arith.mulf %0, %0 : vector<16x32xf32>
    %cst_2 = arith.constant dense<0.000000e+00> : vector<16xf32>
    %6 = vector.multi_reduction <add>, %5, %cst_2 [1] : vector<16x32xf32> to vector<16xf32>
    %7 = vector.shape_cast %6 : vector<16xf32> to vector<16x1xf32>
    %cst_3 = arith.constant 3.200000e+01 : f32
    %8 = vector.broadcast %cst_3 : f32 to vector<16x1xf32>
    %9 = arith.divf %7, %8 : vector<16x1xf32>
    %10 = arith.mulf %4, %4 : vector<16x1xf32>
    %11 = arith.subf %9, %10 : vector<16x1xf32>
    %cst_4 = arith.constant 0.000000e+00 : f32
    %12 = vector.broadcast %cst_4 : f32 to vector<16x1xf32>
    %13 = arith.maximumf %11, %12 : vector<16x1xf32>
    %cst_5 = arith.constant 9.99999974E-6 : f32
    %14 = vector.broadcast %cst_5 : f32 to vector<16x1xf32>
    %15 = arith.addf %13, %14 : vector<16x1xf32>
    %16 = math.rsqrt %15 : vector<16x1xf32>
    %c0_6 = arith.constant 0 : index
    %c0_7 = arith.constant 0 : index
    %17 = vector.load %arg2[%c0_6, %c0_7] : memref<1x32xf32, #tpu.memory_space<vmem>>, vector<1x32xf32>
    %c0_8 = arith.constant 0 : index
    %c0_9 = arith.constant 0 : index
    %18 = vector.load %arg3[%c0_8, %c0_9] : memref<1x32xf32, #tpu.memory_space<vmem>>, vector<1x32xf32>
    %19 = vector.broadcast %4 : vector<16x1xf32> to vector<16x32xf32>
    %20 = arith.subf %0, %19 : vector<16x32xf32>
    %21 = vector.broadcast %16 : vector<16x1xf32> to vector<16x32xf32>
    %22 = arith.mulf %20, %21 : vector<16x32xf32>
    %23 = vector.broadcast %17 : vector<1x32xf32> to vector<16x32xf32>
    %24 = arith.mulf %22, %23 : vector<16x32xf32>
    %25 = vector.broadcast %18 : vector<1x32xf32> to vector<16x32xf32>
    %26 = arith.addf %24, %25 : vector<16x32xf32>
    %c0_10 = arith.constant 0 : index
    %c0_11 = arith.constant 0 : index
    %27 = vector.load %arg4[%c0_10, %c0_11] : memref<16x32xf32, #tpu.memory_space<vmem>>, vector<16x32xf32>
    tpu.vector_store %arg4[%c0_10, %c0_11], %26 {strides = array<i32>} : memref<16x32xf32, #tpu.memory_space<vmem>>, vector<16x32xf32>,
    return
  }
  func.func @transform_0(%arg0: i32) -> (i32, i32) {
    %c0_i32 = arith.constant 0 : i32
    %c0_i32_0 = arith.constant 0 : i32
    return %arg0, %c0_i32 : i32, i32
  }
  func.func @transform_1(%arg0: i32) -> (i32, i32) {
    %c0_i32 = arith.constant 0 : i32
    %c0_i32_0 = arith.constant 0 : i32
    %c0_i32_1 = arith.constant 0 : i32
    return %c0_i32, %c0_i32_0 : i32, i32
  }
  func.func @transform_2(%arg0: i32) -> (i32, i32) {
    %c0_i32 = arith.constant 0 : i32
    %c0_i32_0 = arith.constant 0 : i32
    %c0_i32_1 = arith.constant 0 : i32
    return %c0_i32, %c0_i32_0 : i32, i32
  }
  func.func @transform_3(%arg0: i32) -> (i32, i32) {
    %c0_i32 = arith.constant 0 : i32
    %c0_i32_0 = arith.constant 0 : i32
    return %arg0, %c0_i32 : i32, i32
  }
}

</mosaic_0001>

<bundles_post_ra>
// kernel: tpu_custom_call.1
= control target key start
LH: loop header
LB: loop body
LE: loop exit
PB: predicated region body
PF: predicated region fallthrough
CT: control target
= control target key end

     0   :  { %8 = vsyncpa [#allocation3], 0  ;;  %s226_s0 = inlined_call_operand.hbm [shape: f32[16,32], index: 0, kind: input, shape index: {}]   ;;  %s227_s1 = inlined_call_operand.vmem [shape: f32[1,32], index: 1, kind: input, shape index: {}]   ;;  %s228_s2 = inlined_call_operand.vmem [shape: f32[1,32], index: 2, kind: input, shape index: {}]   ;;  %s229_s3 = inlined_call_operand.hbm [shape: f32[16,32], index: 3, kind: output, shape index: {}]  }
   0x1   :  { %9 = vsyncpa [#allocation4], 0  ;;  %s160_s12 = smov [#allocation2]   ;;  %s112_s16 = scalar_lea.hbm %s226_s0, 256 }
   0x2   :  { %s15_s13 = sshll.u32 %s160_s12, 4  ;;  %p113_p0 = scmp.ne.s32.totalorder %s226_s0, %s112_s16  ;;  %s16_s13 = int_to_ptr.vmem [resolvable:$true] %s15_s13 }
   0x3   :  { %p116_p1 = scmp.lt.u32.totalorder %s112_s16, %s226_s0 }
   0x5   :  { %p118_p2 = pnand %p116_p1, %p113_p0 }
   0x7   :  { %121 = shalt.err (!%p118_p2)
}
   0x8   :  { %s122_s21 = scalar_lea.vmem %s16_s13, 256  ;;  %p127_p4 = scmp.lt.s32.totalorder %s16_s13, %s16_s13 }
   0x9   :  { %p123_p3 = scmp.ne.s32.totalorder %s16_s13, %s122_s21  ;;  %p128_p5 = scmp.lt.s32.totalorder %s122_s21, %s122_s21 }
   0xb   :  { %p129_p6 = por %p128_p5, %p127_p4 }
   0xd   :  { %p130_p7 = pnand %p129_p6, %p123_p3 }
   0xf   :  { %133 = shalt.err (!%p130_p7)
}
  0x10   :  { %s161_s22 = smov 128   ;;  %s162_s23 = smov 8  }
  0x11   :  { %21 = dma.hbm_to_vmem [thread:$0]  %s226_s0, 256, %s16_s13, [#allocation3], %s161_s22, %s161_s22, %s162_s23  }
  0x12   :  { %156 = dma.done.wait [#allocation3], 256  }
  0x13   :  { %157 = vsyncadd [#allocation3], 4294967040  ;;  %vm31_vm0 = vcmask 261120   ;;  %v29_v0 = vld [vmem:[#allocation2] sm:$0xff]  ;;  %v30_v1 = vld [vmem:[#allocation2 + $0x8] sm:$0xff]  ;;  %s163_s29 = smov [#allocation5]  }
  0x14   :  { %v32_v2 = vsel %vm31_vm0, %v29_v0, 0.0  ;;  %v41_v3 = vmul.f32 %v29_v0, %v29_v0  ;;  %v42_v4 = vmul.f32 %v30_v1, %v30_v1  ;;  %v35_v6 = vsel %vm31_vm0, %v30_v1, 0.0  ;;  %v102_v26 = vld [vmem:[%s227_s1] ss:$0 sm:$0xff]  ;;  %s90_s30 = sshll.u32 %s163_s29, 4  ;;  %s91_s30 = int_to_ptr.vmem [resolvable:$true] %s90_s30 }
  0x15   :  { %33 = vadd.xlane.f32.xlu0 %v32_v2  ;;  %v103_v28 = vld [vmem:[%s228_s2] ss:$0 sm:$0xff]  ;;  %s134_s1 = scalar_lea.vmem %s91_s30, 256  ;;  %p139_p9 = scmp.lt.s32.totalorder %s91_s30, %s91_s30 }
  0x16   :  { %v43_v5 = vsel %vm31_vm0, %v41_v3, 0.0  ;;  %v46_v7 = vsel %vm31_vm0, %v42_v4, 0.0  ;;  %p135_p8 = scmp.ne.s32.totalorder %s91_s30, %s134_s1  ;;  %p140_p10 = scmp.lt.s32.totalorder %s134_s1, %s134_s1 }
  0x17   :  { %44 = vadd.xlane.f32.xlu1 %v43_v5 }
  0x18   :  { %p141_p11 = por %p140_p10, %p139_p9 }
  0x19   :  { %36 = vadd.xlane.f32.xlu0 %v35_v6 }
  0x1a   :  { %p142_p12 = pnand %p141_p11, %p135_p8 }
  0x1b   :  { %47 = vadd.xlane.f32.xlu1 %v46_v7 }
  0xa2   :  { %v34_v8 = vpop.xlane.xlu0 %33 }
  0xa3   :  { %v39_v9 = vmul.f32 0.03125, %v34_v8 }
  0xa4   :  { %v45_v10 = vpop.xlane.xlu1 %44 }
  0xa5   :  { %v51_v11 = vmul.f32 %v39_v9, %v39_v9  ;;  %v49_v12 = vmul.f32 0.03125, %v45_v10  ;;  %v63_v24 = vsub.f32 %v29_v0, %v39_v9 }
  0xa6   :  { %v37_v13 = vpop.xlane.xlu0 %36 }
  0xa7   :  { %v53_v14 = vsub.f32 %v49_v12, %v51_v11  ;;  %v40_v15 = vmul.f32 0.03125, %v37_v13 }
  0xa8   :  { %v48_v16 = vpop.xlane.xlu1 %47 }
  0xa9   :  { %v55_v17 = vmax.f32 %v53_v14, 0.0  ;;  %v52_v18 = vmul.f32 %v40_v15, %v40_v15  ;;  %v50_v19 = vmul.f32 0.03125, %v48_v16  ;;  %v64_v29 = vsub.f32 %v30_v1, %v40_v15 }
  0xab   :  { %v57_v20 = vadd.f32 1e-05, %v55_v17  ;;  %v54_v21 = vsub.f32 %v50_v19, %v52_v18 }
  0xad   :  { %108 = vrsqrt.f32 %v57_v20  ;;  %v56_v22 = vmax.f32 %v54_v21, 0.0 }
  0xaf   :  { %v58_v23 = vadd.f32 1e-05, %v56_v22 }
  0xb1   :  { %110 = vrsqrt.f32 %v58_v23 }
  0xb7   :  { %v109_v25 = vpop.eup %108 }
  0xb8   :  { %v65_v27 = vmul.f32 %v109_v25, %v63_v24 }
  0xba   :  { %v73_v30 = vmul.f32 %v102_v26, %v65_v27 }
  0xbb   :  { %v111_v31 = vpop.eup %110 }
  0xbc   :  { %v66_v32 = vmul.f32 %v111_v31, %v64_v29  ;;  %v81_v33 = vadd.f32 %v103_v28, %v73_v30 }
  0xbe   :  { %v74_v34 = vmul.f32 %v102_v26, %v66_v32  ;;  %83 = vst.msk [vmem:[#allocation5] sm:$0xff] %vm31_vm0, %v81_v33 }
  0xc0   :  { %v82_v35 = vadd.f32 %v103_v28, %v74_v34 }
  0xc2   :  { %84 = vst.msk [vmem:[#allocation5 + $0x8] sm:$0xff] %vm31_vm0, %v82_v35 }
  0xc3   :  { %145 = shalt.err (!%p142_p12)
}
  0xc4   :  { %s146_s5 = scalar_lea.hbm %s229_s3, 256 }
  0xc5   :  { %p147_p13 = scmp.ne.s32.totalorder %s229_s3, %s146_s5  ;;  %p150_p0 = scmp.lt.u32.totalorder %s146_s5, %s229_s3 }
  0xc7   :  { %p152_p1 = pnand %p150_p0, %p147_p13 }
  0xc9   :  { %155 = shalt.err (!%p152_p1)
}
  0xca   :  { %96 = dma.vmem_to_hbm [thread:$0]  %s91_s30, 256, %s229_s3, [#allocation4], %s161_s22, %s161_s22, %s162_s23  }
  0xcb   :  { %158 = dma.done.wait [#allocation4], 256  }
  0xcc   :  { %159 = vsyncadd [#allocation4], 4294967040 }
  0xcd   :  { %100 = vsyncpa [#allocation3], 1 }
  0xce   :  { %101 = vsyncpa [#allocation4], 1 }

</bundles_post_ra>
